<compile_context>
chip_gen: v7x
topology: tpu7x:2x2x1
jax: 0.10.0
libtpu: 0.0.40
codegen_flags: <defaults>
</compile_context>

<pallas_src>
import functools
from typing import NamedTuple

import jax
import jax.numpy as jnp
from jax import lax
from jax.experimental import pallas as pl
from jax.experimental.pallas import tpu as pltpu


def _round_up(x, m):
    return (x + m - 1) // m * m


def _layer_norm_rows(y, gamma, beta, *, eps, true_h):
    """Row LayerNorm over the last axis.  Statistics are restricted to the
    first `true_h` lanes so that lane-padding (to a multiple of 128) does not
    perturb mean/var."""
    hp = y.shape[-1]
    if true_h == hp:
        mean = jnp.mean(y, axis=-1, keepdims=True)
        cent = y - mean
        var = jnp.mean(cent * cent, axis=-1, keepdims=True)
    else:
        mask = lax.broadcasted_iota(jnp.int32, (1, hp), 1) < true_h
        inv_h = 1.0 / float(true_h)
        mean = jnp.sum(jnp.where(mask, y, 0.0), axis=-1, keepdims=True) * inv_h
        cent = jnp.where(mask, y - mean, 0.0)
        var = jnp.sum(cent * cent, axis=-1, keepdims=True) * inv_h
    inv = lax.rsqrt(var + eps)
    return cent * inv * gamma + beta


def _resident_kernel(x_ref, w_ref, res_ref, p_ref, o_ref, *, eps, true_h):
    # x_ref: (TM, Ip)  w_ref: (Ip, Hp) VMEM-resident  res_ref/o_ref: (TM, Hp)
    # p_ref: (3, Hp) packed [bias; gamma; beta]
    p = p_ref[...].astype(jnp.float32)
    b, g, be = p[0:1, :], p[1:2, :], p[2:3, :]
    y = jnp.dot(x_ref[...], w_ref[...], preferred_element_type=jnp.float32) + b
    y = jnp.maximum(y, 0.0)
    # TODO(synk): dropout omitted (identity in eval mode; training-mode dropout
    # would need pltpu.prng_seed / prng_random_bits masking here).
    y = y + res_ref[...].astype(jnp.float32)
    o_ref[...] = _layer_norm_rows(y, g, be, eps=eps, true_h=true_h).astype(o_ref.dtype)


def _kreduce_kernel(x_ref, w_ref, res_ref, p_ref, o_ref, acc_ref, *, eps, true_h):
    # Fallback path: weight streamed along the K (last) grid axis.
    k = pl.program_id(1)

    @pl.when(k == 0)
    def _():
        # Initialize the accumulator with the broadcast bias (removes the
        # separate zero-store + bias add from the epilogue).
        acc_ref[...] = jnp.zeros_like(acc_ref) + p_ref[0:1, :].astype(jnp.float32)

    acc_ref[...] += jnp.dot(x_ref[...], w_ref[...],
                            preferred_element_type=jnp.float32)

    @pl.when(k == pl.num_programs(1) - 1)
    def _():
        p = p_ref[...].astype(jnp.float32)
        g, be = p[1:2, :], p[2:3, :]
        y = jnp.maximum(acc_ref[...], 0.0)
        # TODO(synk): dropout omitted (identity in eval mode).
        y = y + res_ref[...].astype(jnp.float32)
        o_ref[...] = _layer_norm_rows(y, g, be, eps=eps,
                                      true_h=true_h).astype(o_ref.dtype)


class OutputLayerParams(NamedTuple):
    weight_t: jax.Array        # (Ip, Hp) pre-transposed, lane-padded
    packed: jax.Array          # (3, Hp)  [bias; gamma; beta], lane-padded
    hidden_size: int           # true H
    intermediate_size: int     # true I
    eps: float


def prepare_output_layer_params(weight, bias, gamma, beta, *, eps=1e-5):
    """One-time parameter prep: transpose weight [H,I]->[I,H], pad I and H to
    multiples of 128 (lane-dense tiles / full MXU width), pack the three H
    vectors into a single (3, Hp) array."""
    H, I = weight.shape
    Ip = _round_up(I, 128)
    Hp = _round_up(H, 128)
    wt = jnp.asarray(weight).T                                    # (I, H)
    wt = jnp.pad(wt, ((0, Ip - I), (0, Hp - H)))
    packed = jnp.stack([jnp.asarray(bias), jnp.asarray(gamma), jnp.asarray(beta)])
    packed = jnp.pad(packed, ((0, 0), (0, Hp - H)))
    return OutputLayerParams(wt, packed, H, I, float(eps))


def output_layer(hidden_states, input_tensor, params: OutputLayerParams):
    """Forward pass.

    hidden_states: [B, S, I]   (I = intermediate_size)
    input_tensor:  [B, S, H]   (residual, H = hidden_size)
    """
    B, S, I = hidden_states.shape
    H = params.hidden_size
    assert I == params.intermediate_size
    Ip, Hp = params.weight_t.shape
    M = B * S
    dtype = hidden_states.dtype
    itemsize = jnp.dtype(dtype).itemsize

    # --- Generation-aware VMEM budget (v5e/v6e: 128 MiB, v7x: 64 MiB / TC). ---
    try:
        vmem_cap = int(pltpu.get_tpu_info().vmem_capacity_bytes)
    except Exception:  # pragma: no cover - conservative fallback
        vmem_cap = 64 * 1024 * 1024
    budget = int(vmem_cap * 0.8)   # headroom for compiler scratch / semaphores

    def resident_est(tm):
        return (2 * tm * Ip         # x tiles (double-buffered)
                + 2 * Ip * Hp       # resident weight (count 2 buffers, conservative)
                + 2 * tm * Hp       # residual tiles
                + 2 * tm * Hp       # output tiles
                + 2 * 3 * Hp        # packed bias/gamma/beta
                ) * itemsize

    TM = min(512, _round_up(M, 8))
    use_resident = False
    est = 0
    for cand in (TM, 256, 128, 64, 32, 16, 8):
        cand = min(cand, TM)
        if resident_est(cand) <= budget:
            TM, est, use_resident = cand, resident_est(cand), True
            break

    if not use_resident:
        # Weight too large to keep VMEM-resident: stream it along a K grid
        # axis (reduction last) with an f32 accumulator.
        TM = min(512, _round_up(M, 8))
        tk_cands = [c for c in (2048, 1024, 512, 256, 128) if Ip % c == 0]

        def kred_est(tm, tk):
            return ((2 * tm * tk + 2 * tk * Hp + 4 * tm * Hp + 2 * 3 * Hp)
                    * itemsize + tm * Hp * 4)

        TK = tk_cands[-1]
        for c in tk_cands:
            if kred_est(TM, c) <= budget:
                TK = c
                break
        while kred_est(TM, TK) > budget and TM > 8:
            TM //= 2
        est = kred_est(TM, TK)

    Mp = _round_up(M, TM)

    x2d = hidden_states.reshape(M, I)
    res2d = input_tensor.reshape(M, H)
    if Mp != M or Ip != I:
        x2d = jnp.pad(x2d, ((0, Mp - M), (0, Ip - I)))
    if Mp != M or Hp != H:
        res2d = jnp.pad(res2d, ((0, Mp - M), (0, Hp - H)))

    vmem_limit = int(min(budget, max(32 * 1024 * 1024, est + (4 << 20))))

    if use_resident:
        kernel = functools.partial(_resident_kernel, eps=params.eps, true_h=H)
        out2d = pl.pallas_call(
            kernel,
            out_shape=jax.ShapeDtypeStruct((Mp, Hp), dtype),
            grid_spec=pltpu.PrefetchScalarGridSpec(
                num_scalar_prefetch=0,
                grid=(Mp // TM,),
                in_specs=[
                    pl.BlockSpec((TM, Ip), lambda i: (i, 0)),    # x
                    pl.BlockSpec((Ip, Hp), lambda i: (0, 0)),    # weight (resident)
                    pl.BlockSpec((TM, Hp), lambda i: (i, 0)),    # residual
                    pl.BlockSpec((3, Hp), lambda i: (0, 0)),     # bias/gamma/beta
                ],
                out_specs=pl.BlockSpec((TM, Hp), lambda i: (i, 0)),
            ),
            compiler_params=pltpu.CompilerParams(
                dimension_semantics=("parallel",),
                vmem_limit_bytes=vmem_limit,
            ),
        )(x2d, params.weight_t, res2d, params.packed)
    else:
        kernel = functools.partial(_kreduce_kernel, eps=params.eps, true_h=H)
        out2d = pl.pallas_call(
            kernel,
            out_shape=jax.ShapeDtypeStruct((Mp, Hp), dtype),
            grid_spec=pltpu.PrefetchScalarGridSpec(
                num_scalar_prefetch=0,
                grid=(Mp // TM, Ip // TK),
                in_specs=[
                    pl.BlockSpec((TM, TK), lambda i, k: (i, k)),   # x
                    pl.BlockSpec((TK, Hp), lambda i, k: (k, 0)),   # W^T (streamed)
                    pl.BlockSpec((TM, Hp), lambda i, k: (i, 0)),   # residual
                    pl.BlockSpec((3, Hp), lambda i, k: (0, 0)),    # bias/gamma/beta
                ],
                out_specs=pl.BlockSpec((TM, Hp), lambda i, k: (i, 0)),
                scratch_shapes=[pltpu.VMEM((TM, Hp), jnp.float32)],
            ),
            compiler_params=pltpu.CompilerParams(
                dimension_semantics=("parallel", "arbitrary"),
                vmem_limit_bytes=vmem_limit,
            ),
        )(x2d, params.weight_t, res2d, params.packed)

    return out2d[:M, :H].reshape(B, S, H)


if __name__ == "__main__":
    # Small shapes consistent with the module:
    # batch=2, seq=8, intermediate_size=64, hidden_size=32.
    B, S, I, H = 2, 8, 64, 32
    eps = 1e-5   # nn.LayerNorm default eps (module uses the default)

    key = jax.random.PRNGKey(0)
    kx, kr, kw, kb = jax.random.split(key, 4)

    hidden_states = jax.random.normal(kx, (B, S, I), dtype=jnp.float32)
    input_tensor = jax.random.normal(kr, (B, S, H), dtype=jnp.float32)

    # nn.Linear(intermediate_size, hidden_size): weight [H, I], bias [H].
    bound = 1.0 / (I ** 0.5)
    weight = jax.random.uniform(kw, (H, I), minval=-bound, maxval=bound,
                                dtype=jnp.float32)
    bias = jax.random.uniform(kb, (H,), minval=-bound, maxval=bound,
                              dtype=jnp.float32)
    # nn.LayerNorm default affine init.
    gamma = jnp.ones((H,), dtype=jnp.float32)
    beta = jnp.zeros((H,), dtype=jnp.float32)

    # One-time parameter prep (transpose + pad + pack).
    params = prepare_output_layer_params(weight, bias, gamma, beta, eps=eps)

    out = output_layer(hidden_states, input_tensor, params)
    out = jax.block_until_ready(out)

    # Reference (same math as the PyTorch forward; dropout = identity in eval).
    y = jnp.einsum("bsi,hi->bsh", hidden_states, weight) + bias
    y = jnp.maximum(y, 0.0)
    y = y + input_tensor
    mean = y.mean(axis=-1, keepdims=True)
    var = ((y - mean) ** 2).mean(axis=-1, keepdims=True)
    ref = (y - mean) / jnp.sqrt(var + eps) * gamma + beta

    assert out.shape == (B, S, H)
    err = float(jnp.max(jnp.abs(out - ref)))
    assert jnp.allclose(out, ref, atol=1e-4, rtol=1e-4), err

    print("KERNEL_OK")
</pallas_src>

<mosaic_0001>
module attributes {stable_mosaic.version = 11 : i64} {
  func.func @_resident_kernel(%arg0: i32, %arg1: memref<16x128xf32, #tpu.memory_space<vmem>>, %arg2: memref<128x128xf32, #tpu.memory_space<vmem>>, %arg3: memref<16x128xf32, #tpu.memory_space<vmem>>, %arg4: memref<3x128xf32, #tpu.memory_space<vmem>>, %arg5: memref<16x128xf32, #tpu.memory_space<vmem>>) attributes {dimension_semantics = [#tpu.dimension_semantics<parallel>], iteration_bounds = array<i64: 1>, scalar_prefetch = 0 : i64, scratch_operands = 0 : i64, tpu.core_type = #tpu.core_type<tc>, window_params = [{transform_indices = @transform_0, window_bounds = array<i64: 16, 128>}, {pipeline_mode = #tpu.pipeline_mode<synchronous>, transform_indices = @transform_1, window_bounds = array<i64: 128, 128>}, {transform_indices = @transform_2, window_bounds = array<i64: 16, 128>}, {pipeline_mode = #tpu.pipeline_mode<synchronous>, transform_indices = @transform_3, window_bounds = array<i64: 3, 128>}, {transform_indices = @transform_4, window_bounds = array<i64: 16, 128>}]} {
    %c0 = arith.constant 0 : index
    %c0_0 = arith.constant 0 : index
    %0 = vector.load %arg4[%c0, %c0_0] : memref<3x128xf32, #tpu.memory_space<vmem>>, vector<3x128xf32>
    %1 = vector.extract_strided_slice %0 {offsets = [0, 0], sizes = [1, 128], strides = [1, 1]} : vector<3x128xf32> to vector<1x128xf32>
    %2 = vector.extract_strided_slice %0 {offsets = [1, 0], sizes = [1, 128], strides = [1, 1]} : vector<3x128xf32> to vector<1x128xf32>
    %3 = vector.extract_strided_slice %0 {offsets = [2, 0], sizes = [1, 128], strides = [1, 1]} : vector<3x128xf32> to vector<1x128xf32>
    %c0_1 = arith.constant 0 : index
    %c0_2 = arith.constant 0 : index
    %4 = vector.load %arg1[%c0_1, %c0_2] : memref<16x128xf32, #tpu.memory_space<vmem>>, vector<16x128xf32>
    %c0_3 = arith.constant 0 : index
    %c0_4 = arith.constant 0 : index
    %5 = vector.load %arg2[%c0_3, %c0_4] : memref<128x128xf32, #tpu.memory_space<vmem>>, vector<128x128xf32>
    %cst = arith.constant dense<0.000000e+00> : vector<16x128xf32>
    %6 = tpu.matmul %4, %5, %cst {dimension_numbers = #tpu.dot_dimension_numbers<[1], [0], [0], [1], [0, 0, 1, 1], [], []>} : vector<16x128xf32>, vector<128x128xf32>, vector<16x128xf32> -> vector<16x128xf32>
    %7 = vector.broadcast %1 : vector<1x128xf32> to vector<16x128xf32>
    %8 = arith.addf %6, %7 : vector<16x128xf32>
    %cst_5 = arith.constant 0.000000e+00 : f32
    %9 = vector.broadcast %cst_5 : f32 to vector<16x128xf32>
    %10 = arith.maximumf %8, %9 : vector<16x128xf32>
    %c0_6 = arith.constant 0 : index
    %c0_7 = arith.constant 0 : index
    %11 = vector.load %arg3[%c0_6, %c0_7] : memref<16x128xf32, #tpu.memory_space<vmem>>, vector<16x128xf32>
    %12 = arith.addf %10, %11 : vector<16x128xf32>
    %13 = tpu.iota {dimensions = array<i32: 1>} : vector<1x128xi32>
    %c32_i32 = arith.constant 32 : i32
    %14 = vector.broadcast %c32_i32 : i32 to vector<1x128xi32>
    %15 = arith.cmpi slt, %13, %14 : vector<1x128xi32>
    %cst_8 = arith.constant 0.000000e+00 : f32
    %16 = vector.shape_cast %15 : vector<1x128xi1> to vector<1x128xi1>
    %17 = vector.broadcast %16 : vector<1x128xi1> to vector<16x128xi1>
    %18 = vector.broadcast %cst_8 : f32 to vector<16x128xf32>
    %19 = arith.select %17, %12, %18 : vector<16x128xi1>, vector<16x128xf32>
    %cst_9 = arith.constant dense<0.000000e+00> : vector<16xf32>
    %20 = vector.multi_reduction <add>, %19, %cst_9 [1] : vector<16x128xf32> to vector<16xf32>
    %21 = vector.shape_cast %20 : vector<16xf32> to vector<16x1xf32>
    %cst_10 = arith.constant 3.125000e-02 : f32
    %22 = vector.broadcast %cst_10 : f32 to vector<16x1xf32>
    %23 = arith.mulf %21, %22 : vector<16x1xf32>
    %24 = vector.broadcast %23 : vector<16x1xf32> to vector<16x128xf32>
    %25 = arith.subf %12, %24 : vector<16x128xf32>
    %cst_11 = arith.constant 0.000000e+00 : f32
    %26 = vector.shape_cast %15 : vector<1x128xi1> to vector<1x128xi1>
    %27 = vector.broadcast %26 : vector<1x128xi1> to vector<16x128xi1>
    %28 = vector.broadcast %cst_11 : f32 to vector<16x128xf32>
    %29 = arith.select %27, %25, %28 : vector<16x128xi1>, vector<16x128xf32>
    %30 = arith.mulf %29, %29 : vector<16x128xf32>
    %cst_12 = arith.constant dense<0.000000e+00> : vector<16xf32>
    %31 = vector.multi_reduction <add>, %30, %cst_12 [1] : vector<16x128xf32> to vector<16xf32>
    %32 = vector.shape_cast %31 : vector<16xf32> to vector<16x1xf32>
    %cst_13 = arith.constant 3.125000e-02 : f32
    %33 = vector.broadcast %cst_13 : f32 to vector<16x1xf32>
    %34 = arith.mulf %32, %33 : vector<16x1xf32>
    %cst_14 = arith.constant 9.99999974E-6 : f32
    %35 = vector.broadcast %cst_14 : f32 to vector<16x1xf32>
    %36 = arith.addf %34, %35 : vector<16x1xf32>
    %37 = math.rsqrt %36 : vector<16x1xf32>
    %38 = vector.broadcast %37 : vector<16x1xf32> to vector<16x128xf32>
    %39 = arith.mulf %29, %38 : vector<16x128xf32>
    %40 = vector.broadcast %2 : vector<1x128xf32> to vector<16x128xf32>
    %41 = arith.mulf %39, %40 : vector<16x128xf32>
    %42 = vector.broadcast %3 : vector<1x128xf32> to vector<16x128xf32>
    %43 = arith.addf %41, %42 : vector<16x128xf32>
    %c0_15 = arith.constant 0 : index
    %c0_16 = arith.constant 0 : index
    %44 = vector.load %arg5[%c0_15, %c0_16] : memref<16x128xf32, #tpu.memory_space<vmem>>, vector<16x128xf32>
    tpu.vector_store %arg5[%c0_15, %c0_16], %43 {strides = array<i32>} : memref<16x128xf32, #tpu.memory_space<vmem>>, vector<16x128xf32>,
    return
  }
  func.func @transform_0(%arg0: i32) -> (i32, i32) {
    %c0_i32 = arith.constant 0 : i32
    %c0_i32_0 = arith.constant 0 : i32
    return %arg0, %c0_i32 : i32, i32
  }
  func.func @transform_1(%arg0: i32) -> (i32, i32) {
    %c0_i32 = arith.constant 0 : i32
    %c0_i32_0 = arith.constant 0 : i32
    %c0_i32_1 = arith.constant 0 : i32
    return %c0_i32, %c0_i32_0 : i32, i32
  }
  func.func @transform_2(%arg0: i32) -> (i32, i32) {
    %c0_i32 = arith.constant 0 : i32
    %c0_i32_0 = arith.constant 0 : i32
    return %arg0, %c0_i32 : i32, i32
  }
  func.func @transform_3(%arg0: i32) -> (i32, i32) {
    %c0_i32 = arith.constant 0 : i32
    %c0_i32_0 = arith.constant 0 : i32
    %c0_i32_1 = arith.constant 0 : i32
    return %c0_i32, %c0_i32_0 : i32, i32
  }
  func.func @transform_4(%arg0: i32) -> (i32, i32) {
    %c0_i32 = arith.constant 0 : i32
    %c0_i32_0 = arith.constant 0 : i32
    return %arg0, %c0_i32 : i32, i32
  }
}

</mosaic_0001>

<bundles_post_ra>
// kernel: tpu_custom_call.1
= control target key start
LH: loop header
LB: loop body
LE: loop exit
PB: predicated region body
PF: predicated region fallthrough
CT: control target
= control target key end

     0   :  { %9 = vsyncpa [#allocation3], 0  ;;  %s520_s0 = inlined_call_operand.hbm [shape: f32[16,128], index: 0, kind: input, shape index: {}]   ;;  %s521_s1 = inlined_call_operand.hbm [shape: f32[128,128], index: 1, kind: input, shape index: {}]   ;;  %s522_s2 = inlined_call_operand.hbm [shape: f32[16,128], index: 2, kind: input, shape index: {}]   ;;  %s523_s3 = inlined_call_operand.vmem [shape: f32[3,128], index: 3, kind: input, shape index: {}]   ;;  %s524_s4 = inlined_call_operand.hbm [shape: f32[16,128], index: 4, kind: output, shape index: {}]  }
   0x1   :  { %10 = vsyncpa [#allocation6], 0 }
   0x2   :  { %11 = vsyncpa [#allocation4], 0  ;;  %s415_s15 = smov [#allocation5]   ;;  %s416_s17 = smov [#allocation2]  }
   0x3   :  { %s29_s16 = sshll.u32 %s415_s15, 4  ;;  %s17_s18 = sshll.u32 %s416_s17, 4  ;;  %s30_s16 = int_to_ptr.vmem [resolvable:$true] %s29_s16  ;;  %s446_s18 = int_to_ptr.vmem [resolvable:$true] %s17_s18 }
   0x4   :  { %s321_s21 = scalar_lea.hbm %s521_s1, 2048 }
   0x5   :  { %p322_p0 = scmp.ne.s32.totalorder %s521_s1, %s321_s21  ;;  %p325_p1 = scmp.lt.u32.totalorder %s321_s21, %s521_s1 }
   0x7   :  { %p327_p2 = pnand %p325_p1, %p322_p0 }
   0x9   :  { %330 = shalt.err (!%p327_p2)
}
   0xa   :  { %s331_s26 = scalar_lea.vmem %s30_s16, 2048  ;;  %p336_p4 = scmp.lt.s32.totalorder %s30_s16, %s30_s16 }
   0xb   :  { %p332_p3 = scmp.ne.s32.totalorder %s30_s16, %s331_s26  ;;  %p337_p5 = scmp.lt.s32.totalorder %s331_s26, %s331_s26 }
   0xd   :  { %p338_p6 = por %p337_p5, %p336_p4 }
   0xf   :  { %p339_p7 = pnand %p338_p6, %p332_p3 }
  0x11   :  { %342 = shalt.err (!%p339_p7)
}
  0x12   :  { %s417_s27 = smov 128   ;;  %s418_s28 = smov 8  }
  0x13   :  { %35 = dma.hbm_to_vmem [thread:$0]  %s521_s1, 2048, %s30_s16, [#allocation6], %s417_s27, %s417_s27, %s418_s28  }
  0x14   :  { %s343_s7 = scalar_lea.hbm %s520_s0, 256 }
  0x15   :  { %p344_p8 = scmp.ne.s32.totalorder %s520_s0, %s343_s7  ;;  %p347_p9 = scmp.lt.u32.totalorder %s343_s7, %s520_s0 }
  0x17   :  { %p349_p10 = pnand %p347_p9, %p344_p8 }
  0x19   :  { %352 = shalt.err (!%p349_p10)
}
  0x1a   :  { %s353_s12 = scalar_lea.vmem %s446_s18, 256  ;;  %p358_p12 = scmp.lt.s32.totalorder %s446_s18, %s446_s18 }
  0x1b   :  { %p354_p11 = scmp.ne.s32.totalorder %s446_s18, %s353_s12  ;;  %p359_p13 = scmp.lt.s32.totalorder %s353_s12, %s353_s12 }
  0x1d   :  { %p360_p0 = por %p359_p13, %p358_p12 }
  0x1f   :  { %p361_p1 = pnand %p360_p0, %p354_p11 }
  0x21   :  { %364 = shalt.err (!%p361_p1)
}
  0x22   :  { %23 = dma.hbm_to_vmem [thread:$0]  %s520_s0, 256, %s446_s18, [#allocation3], %s417_s27, %s417_s27, %s418_s28  }
  0x23   :  { %s419_s14 = smov [#allocation7]   ;;  %s365_s19 = scalar_lea.hbm %s522_s2, 256 }
  0x24   :  { %s41_s15 = sshll.u32 %s419_s14, 4  ;;  %p366_p2 = scmp.ne.s32.totalorder %s522_s2, %s365_s19  ;;  %s42_s15 = int_to_ptr.vmem [resolvable:$true] %s41_s15 }
  0x25   :  { %p369_p3 = scmp.lt.u32.totalorder %s365_s19, %s522_s2 }
  0x27   :  { %p371_p4 = pnand %p369_p3, %p366_p2 }
  0x29   :  { %374 = shalt.err (!%p371_p4)
}
  0x2a   :  { %s375_s24 = scalar_lea.vmem %s42_s15, 256  ;;  %p380_p6 = scmp.lt.s32.totalorder %s42_s15, %s42_s15 }
  0x2b   :  { %p376_p5 = scmp.ne.s32.totalorder %s42_s15, %s375_s24  ;;  %p381_p7 = scmp.lt.s32.totalorder %s375_s24, %s375_s24 }
  0x2d   :  { %p382_p8 = por %p381_p7, %p380_p6 }
  0x2f   :  { %p383_p9 = pnand %p382_p8, %p376_p5 }
  0x31   :  { %386 = shalt.err (!%p383_p9)
}
  0x32   :  { %47 = dma.hbm_to_vmem [thread:$0]  %s522_s2, 256, %s42_s15, [#allocation6], %s417_s27, %s417_s27, %s418_s28  }
  0x33   :  { %409 = dma.done.wait [#allocation3], 256  }
  0x34   :  { %410 = vsyncadd [#allocation3], 4294967040 }
  0x35   :  { %411 = dma.done.wait [#allocation6], 2304  }
  0x36   :  { %412 = vsyncadd [#allocation6], 4294964992  ;;  %v62_v0 = vld [vmem:[#allocation5] sm:$0xff]  ;;  %v63_v1 = vld [vmem:[#allocation5 + $0x8] sm:$0xff]  ;;  %v78_v26 = vlaneseq }
  0x37   :  { %v64_v2 = vld [vmem:[#allocation5 + $0x10] sm:$0xff]  ;;  %v279_v3 = vpack.c.bf16 %v63_v1, %v62_v0  ;;  %v65_v4 = vld [vmem:[#allocation5 + $0x18] sm:$0xff]  ;;  %v66_v6 = vld [vmem:[#allocation5 + $0x20] sm:$0xff] }
  0x38   :  { %v283_v5 = vpack.c.bf16 %v65_v4, %v64_v2  ;;  %v67_v7 = vld [vmem:[#allocation5 + $0x28] sm:$0xff]  ;;  %v60_v9 = vld [vmem:[#allocation2] sm:$0xff]  ;;  %v69_v11 = vld [vmem:[#allocation5 + $0x38] sm:$0xff]  ;;  %v79_v27 = vshrl.u32 %v78_v26, 7  ;;  %v164_v34 = vand.u32 127, %v78_v26 }
  0x39   :  { %280 = vmatprep.subr.bf16.mxu0 %v279_v3  ;;  %v287_v8 = vpack.c.bf16 %v67_v7, %v66_v6  ;;  %v68_v10 = vld [vmem:[#allocation5 + $0x30] sm:$0xff]  ;;  %276 = vmatprep.mubr.f32.mxu0 %v60_v9  ;;  %v70_v13 = vld [vmem:[#allocation5 + $0x40] sm:$0xff]  ;;  %v71_v14 = vld [vmem:[#allocation5 + $0x48] sm:$0xff] }
  0x3a   :  { %282 = vmatpush3.bf16.msra.mxu0 %v279_v3  ;;  %v291_v12 = vpack.c.bf16 %v69_v11, %v68_v10  ;;  %v295_v15 = vpack.c.bf16 %v71_v14, %v70_v13  ;;  %v72_v16 = vld [vmem:[#allocation5 + $0x50] sm:$0xff]  ;;  %v73_v17 = vld [vmem:[#allocation5 + $0x58] sm:$0xff]  ;;  %v74_v19 = vld [vmem:[#allocation5 + $0x60] sm:$0xff]  ;;  %v80_v28 = vsub.s32 0, %v79_v27  ;;  %vm165_vm0 = vcmp.lt.s32.totalorder %v164_v34, 32 }
  0x3b   :  { %284 = vmatprep.subr.bf16.mxu0 %v283_v5  ;;  %v299_v18 = vpack.c.bf16 %v73_v17, %v72_v16  ;;  %v75_v20 = vld [vmem:[#allocation5 + $0x68] sm:$0xff]  ;;  %v76_v22 = vld [vmem:[#allocation5 + $0x70] sm:$0xff]  ;;  %v77_v23 = vld [vmem:[#allocation5 + $0x78] sm:$0xff]  ;;  %v196_v60 = vsub.s32 1, %v79_v27  ;;  %v202_v61 = vsub.s32 2, %v79_v27 }
  0x3c   :  { %v303_v21 = vpack.c.bf16 %v75_v20, %v74_v19  ;;  %v307_v24 = vpack.c.bf16 %v77_v23, %v76_v22  ;;  %v61_v25 = vld [vmem:[#allocation2 + $0x8] sm:$0xff]  ;;  %v59_v29 = vld [vmem:[%s523_s3] sm:$0x7]  ;;  %v159_v36 = vld [vmem:[#allocation7] sm:$0xff]  ;;  %s420_s3 = smov [#allocation8]  }
  0x3d   :  { %v81_v30 = vrot.slane %v59_v29, %v80_v28  ;;  %v160_v39 = vld [vmem:[#allocation7 + $0x8] sm:$0xff]  ;;  %v197_v62 = vrot.slane %v59_v29, %v196_v60  ;;  %v203_v0 = vrot.slane %v59_v29, %v202_v61  ;;  %s213_s26 = sshll.u32 %s420_s3, 4  ;;  %s214_s26 = int_to_ptr.vmem [resolvable:$true] %s213_s26 }
  0x3e   :  { %286 = vmatpush3.bf16.msra.mxu0 %v283_v5  ;;  %s387_s29 = scalar_lea.vmem %s214_s26, 256  ;;  %p392_p11 = scmp.lt.s32.totalorder %s214_s26, %s214_s26 }
  0x3f   :  { %288 = vmatprep.subr.bf16.mxu0 %v287_v8  ;;  %p388_p10 = scmp.ne.s32.totalorder %s214_s26, %s387_s29  ;;  %p393_p12 = scmp.lt.s32.totalorder %s387_s29, %s387_s29 }
  0x41   :  { %p394_p13 = por %p393_p12, %p392_p11 }
  0x42   :  { %290 = vmatpush3.bf16.msra.mxu0 %v287_v8 }
  0x43   :  { %292 = vmatprep.subr.bf16.mxu0 %v291_v12  ;;  %p395_p0 = pnand %p394_p13, %p388_p10 }
  0x46   :  { %294 = vmatpush3.bf16.msra.mxu0 %v291_v12 }
  0x47   :  { %296 = vmatprep.subr.bf16.mxu0 %v295_v15 }
  0x4a   :  { %298 = vmatpush3.bf16.msra.mxu0 %v295_v15 }
  0x4b   :  { %300 = vmatprep.subr.bf16.mxu0 %v299_v18 }
  0x4e   :  { %302 = vmatpush3.bf16.msra.mxu0 %v299_v18 }
  0x4f   :  { %304 = vmatprep.subr.bf16.mxu0 %v303_v21 }
  0x52   :  { %306 = vmatpush3.bf16.msra.mxu0 %v303_v21 }
  0x53   :  { %308 = vmatprep.subr.bf16.mxu0 %v307_v24 }
  0x56   :  { %310 = vmatpush3.bf16.msra.mxu0 %v307_v24 }
  0x59   :  { %277 = vmatmul.mubr.f32.vlgmr.msra.gmra.mrb[0].mxu0 %v61_v25 }
 0x12c   :  { %v278_v31 = vpop.f32.mrb[0].mxu0 }
 0x12d   :  { %v154_v32 = vadd.f32 %v278_v31, %v81_v30  ;;  %v148_v33 = vpop.f32.mrb[1].mxu0 }
 0x12e   :  { %v149_v35 = vadd.f32 %v148_v33, %v81_v30 }
 0x12f   :  { %v158_v37 = vmax.f32 %v154_v32, 0.0 }
 0x130   :  { %v157_v38 = vmax.f32 %v149_v35, 0.0 }
 0x131   :  { %v162_v42 = vadd.f32 %v160_v39, %v158_v37 }
 0x132   :  { %v161_v40 = vadd.f32 %v159_v36, %v157_v38 }
 0x133   :  { %v169_v43 = vsel %vm165_vm0, %v162_v42, 0.0 }
 0x134   :  { %v168_v41 = vsel %vm165_vm0, %v161_v40, 0.0 }
 0x135   :  { %170 = vadd.xlane.f32.xlu0 %v168_v41 }
 0x139   :  { %172 = vadd.xlane.f32.xlu0 %v169_v43 }
 0x1c2   :  { %v171_v44 = vpop.xlane.xlu0 %170 }
 0x1c3   :  { %v174_v45 = vmul.f32 0.03125, %v171_v44 }
 0x1c5   :  { %v176_v46 = vsub.f32 %v161_v40, %v174_v45 }
 0x1c6   :  { %v173_v47 = vpop.xlane.xlu0 %172 }
 0x1c7   :  { %v175_v48 = vmul.f32 0.03125, %v173_v47  ;;  %v178_v49 = vsel %vm165_vm0, %v176_v46, 0.0 }
 0x1c8   :  { %v180_v50 = vmul.f32 %v178_v49, %v178_v49 }
 0x1c9   :  { %v177_v51 = vsub.f32 %v162_v42, %v175_v48 }
 0x1ca   :  { %182 = vadd.xlane.f32.xlu1 %v180_v50 }
 0x1cb   :  { %v179_v52 = vsel %vm165_vm0, %v177_v51, 0.0 }
 0x1cc   :  { %v181_v53 = vmul.f32 %v179_v52, %v179_v52 }
 0x1ce   :  { %184 = vadd.xlane.f32.xlu1 %v181_v53 }
 0x257   :  { %v183_v54 = vpop.xlane.xlu1 %182 }
 0x258   :  { %v186_v55 = vmul.f32 0.03125, %v183_v54 }
 0x25a   :  { %v188_v56 = vadd.f32 1e-05, %v186_v55 }
 0x25b   :  { %v185_v57 = vpop.xlane.xlu1 %184 }
 0x25c   :  { %317 = vrsqrt.f32 %v188_v56  ;;  %v187_v58 = vmul.f32 0.03125, %v185_v57 }
 0x25e   :  { %v189_v59 = vadd.f32 1e-05, %v187_v58 }
 0x260   :  { %319 = vrsqrt.f32 %v189_v59 }
 0x266   :  { %v318_v63 = vpop.eup %317 }
 0x267   :  { %v192_v1 = vmul.f32 %v318_v63, %v178_v49 }
 0x269   :  { %v198_v2 = vmul.f32 %v197_v62, %v192_v1 }
 0x26a   :  { %v320_v3 = vpop.eup %319 }
 0x26b   :  { %v193_v4 = vmul.f32 %v320_v3, %v179_v52  ;;  %v204_v5 = vadd.f32 %v203_v0, %v198_v2 }
 0x26d   :  { %v199_v6 = vmul.f32 %v197_v62, %v193_v4  ;;  %206 = vst [vmem:[#allocation8] sm:$0xff] %v204_v5 }
 0x26f   :  { %v205_v7 = vadd.f32 %v203_v0, %v199_v6 }
 0x271   :  { %207 = vst [vmem:[#allocation8 + $0x8] sm:$0xff] %v205_v7 }
 0x272   :  { %398 = shalt.err (!%p395_p0)
}
 0x273   :  { %s399_s6 = scalar_lea.hbm %s524_s4, 256 }
 0x274   :  { %p400_p1 = scmp.ne.s32.totalorder %s524_s4, %s399_s6  ;;  %p403_p2 = scmp.lt.u32.totalorder %s399_s6, %s524_s4 }
 0x276   :  { %p405_p3 = pnand %p403_p2, %p400_p1 }
 0x278   :  { %408 = shalt.err (!%p405_p3)
}
 0x279   :  { %219 = dma.vmem_to_hbm [thread:$0]  %s214_s26, 256, %s524_s4, [#allocation4], %s417_s27, %s417_s27, %s418_s28  }
 0x27a   :  { %413 = dma.done.wait [#allocation4], 256  }
 0x27b   :  { %414 = vsyncadd [#allocation4], 4294967040 }
 0x27c   :  { %223 = vsyncpa [#allocation3], 1 }
 0x27d   :  { %224 = vsyncpa [#allocation6], 1 }
 0x27e   :  { %225 = vsyncpa [#allocation4], 1 }

</bundles_post_ra>
